<compile_context>
chip_gen: v7x
topology: tpu7x:2x2x1
jax: 0.10.0
libtpu: 0.0.40
codegen_flags: <defaults>
</compile_context>

<pallas_src>
import functools

import jax
import jax.numpy as jnp
from jax.experimental import pallas as pl
from jax.experimental.pallas import tpu as pltpu

EPS = 1e-3


# ----------------------------------- kernel -----------------------------------

def resnext_kernel(x_ref, w1_ref, w2_ref, wdw_ref, w3_ref, b_ref, m_ref, o_ref, *, W):
    """One lane tile of the channels-major (C, N*H*W) slab.

    lane index p (within the tile) = n*HW + h*W + w;  the tile always covers whole batch
    elements, so the precomputed masks (built from p % HW and p % W) zero every shifted
    value that would cross an H border, a W border, or a batch boundary.
    """
    Chpad = w1_ref.shape[0]
    C, L = x_ref.shape

    x = x_ref[...].astype(jnp.float32)                               # (C, L)

    b1 = b_ref[0:Chpad, 0:1]                                         # (Chpad, 1)
    b2 = b_ref[0:Chpad, 1:2]                                         # (Chpad, 1)
    b3 = b_ref[0:C, 2:3]                                             # (C, 1)

    # --- stage 1: 1x1 conv (C -> Chpad), folded-BN bias, ReLU (one MXU dot) ---
    h1 = jnp.dot(w1_ref[...], x, preferred_element_type=jnp.float32)
    h1 = jnp.maximum(h1 + b1, 0.0)                                   # (Chpad, L)

    # --- stage 2a: grouped (3,1) conv along H, padding (1,0) ---
    # three accumulating dots (kh = 0 / 1 / 2), shifted copies masked by precomputed masks
    up = m_ref[0] * pltpu.roll(h1, W, axis=1)                        # h1[p - W]
    dn = m_ref[1] * pltpu.roll(h1, L - W, axis=1)                    # h1[p + W]
    a = (jnp.dot(w2_ref[0:Chpad, :], up, preferred_element_type=jnp.float32)
         + jnp.dot(w2_ref[Chpad:2 * Chpad, :], h1, preferred_element_type=jnp.float32)
         + jnp.dot(w2_ref[2 * Chpad:3 * Chpad, :], dn, preferred_element_type=jnp.float32))

    # --- stage 2b: depthwise (1,3) conv along W, padding (0,1) (VPU), bias, ReLU ---
    lt = m_ref[2] * pltpu.roll(a, 1, axis=1)                         # a[p - 1]
    rt = m_ref[3] * pltpu.roll(a, L - 1, axis=1)                     # a[p + 1]
    h2 = wdw_ref[:, 0:1] * lt + wdw_ref[:, 1:2] * a + wdw_ref[:, 2:3] * rt
    h2 = jnp.maximum(h2 + b2, 0.0)                                   # (Chpad, L)

    # --- stage 3: 1x1 conv (Chpad -> C), folded-BN bias, ReLU, residual ---
    h3 = jnp.dot(w3_ref[...], h2, preferred_element_type=jnp.float32)
    o_ref[...] = jnp.maximum(h3 + b3, 0.0) + x


# ----------------------------------- wrapper -----------------------------------

def _const_spec(arr):
    nd = arr.ndim
    return pl.BlockSpec(arr.shape, lambda t, _nd=nd: (0,) * _nd)


def _pick_lane_tile(N, HW, target_lanes=1024):
    """Lane tile = (batch elements per step) * HW.  Grow toward `target_lanes` but keep
    at least two grid steps when N >= 2 so both v7x TensorCores get work."""
    nb = max(1, min(target_lanes // HW, N))
    if N >= 2:
        nb = max(1, min(nb, N // 2))
    while N % nb:
        nb -= 1
    return nb * HW


def resnext_forward(x_nchw, kparams, *, lane_tile=None):
    N, C, H, W = x_nchw.shape
    HW = H * W
    L_total = N * HW

    w1f = kparams["w1"]
    w2s = kparams["w2"]
    wdwf = kparams["wdw"]
    w3f = kparams["w3"]
    bias = kparams["bias"]
    Chpad = w1f.shape[0]

    if lane_tile is None:
        lane_tile = _pick_lane_tile(N, HW)
    assert lane_tile % HW == 0 and L_total % lane_tile == 0

    # channels-major slab: lane p = n*HW + h*W + w  (layout plumbing only, no compute)
    x2d = (x_nchw.reshape(N, C, HW).transpose(1, 0, 2)
           .reshape(C, L_total).astype(jnp.float32))

    # precomputed 0/1 border masks; identical for every lane tile, kept resident in VMEM
    p = jnp.arange(lane_tile)
    ph, pw = p % HW, p % W
    masks = jnp.stack([ph >= W,           # "up"   shift valid (not first H row)
                       ph < HW - W,       # "down" shift valid (not last H row)
                       pw != 0,           # "left" shift valid (not first column)
                       pw != W - 1],      # "right" shift valid (not last column)
                      axis=0).astype(jnp.float32)
    masks = jnp.broadcast_to(masks[:, None, :], (4, Chpad, lane_tile))

    grid = (L_total // lane_tile,)
    out2d = pl.pallas_call(
        functools.partial(resnext_kernel, W=W),
        out_shape=jax.ShapeDtypeStruct((C, L_total), jnp.float32),
        grid_spec=pltpu.PrefetchScalarGridSpec(
            num_scalar_prefetch=0,
            grid=grid,
            in_specs=[pl.BlockSpec((C, lane_tile), lambda t: (0, t)),
                      _const_spec(w1f), _const_spec(w2s), _const_spec(wdwf),
                      _const_spec(w3f), _const_spec(bias), _const_spec(masks)],
            out_specs=pl.BlockSpec((C, lane_tile), lambda t: (0, t)),
        ),
        compiler_params=pltpu.CompilerParams(dimension_semantics=("parallel",)),
    )(x2d, w1f, w2s, wdwf, w3f, bias, masks)

    return out2d.reshape(C, N, HW).transpose(1, 0, 2).reshape(N, C, H, W)


# ---------------- parameter construction (deterministic, in-script) ----------------

def init_raw_params(key, c, groups, cgroups):
    """Weights in PyTorch layouts: conv weight OIHW, BN (gamma, beta, mean, var)."""
    ch = c // 2
    k1, k2, k3, k4 = jax.random.split(key, 4)
    raw = {
        "w1":  0.2 * jax.random.normal(k1, (ch, c // cgroups, 1, 1), jnp.float32),
        "w2":  0.2 * jax.random.normal(k2, (ch, ch // groups, 3, 1), jnp.float32),
        "wdw": 0.2 * jax.random.normal(k3, (ch, 1, 1, 3), jnp.float32),
        "w3":  0.2 * jax.random.normal(k4, (c, ch // cgroups, 1, 1), jnp.float32),
    }

    def bn_stats(n, i):
        idx = jnp.arange(n, dtype=jnp.float32)
        gamma = 1.0 + 0.1 * idx
        beta = 0.05 * idx - 0.02 * i
        mean = 0.01 * idx + 0.03 * i
        var = 1.0 + 0.02 * idx
        return gamma, beta, mean, var

    raw["bn1"] = bn_stats(ch, 1)
    raw["bn2"] = bn_stats(ch, 2)
    raw["bn3"] = bn_stats(c, 3)
    return raw


def to_kernel_params(raw, c, groups, cgroups):
    """PyTorch-layout weights -> dense left-multiplication matrices (block-diagonal where
    grouped) with BN scales folded in, zero-padded so every Ch-sized axis becomes a full
    8-sublane tile, plus packed per-channel biases."""
    ch = c // 2
    chpad = ((max(ch, 8) + 7) // 8) * 8

    def fold_bn(stats):
        gamma, beta, mean, var = stats
        scale = gamma / jnp.sqrt(var + EPS)
        bias = beta - mean * scale
        return scale, bias

    s1, b1 = fold_bn(raw["bn1"])
    s2, b2 = fold_bn(raw["bn2"])
    s3, b3 = fold_bn(raw["bn3"])

    def dense_1x1(w, cin, cout, g):
        # w: (cout, cin//g, 1, 1)  ->  dense (cout, cin) so that out = W @ x
        w2d = w[:, :, 0, 0]
        cig, cog = cin // g, cout // g
        dense = jnp.zeros((cout, cin), jnp.float32)
        for gi in range(g):
            dense = dense.at[gi * cog:(gi + 1) * cog,
                             gi * cig:(gi + 1) * cig].set(w2d[gi * cog:(gi + 1) * cog])
        return dense

    # stage 1: (chpad, c), BN1 scale folded into rows, padding rows zero
    w1f = jnp.zeros((chpad, c), jnp.float32)
    w1f = w1f.at[:ch].set(s1[:, None] * dense_1x1(raw["w1"], c, ch, cgroups))

    # stage 2a: three stacked (chpad, chpad) matrices, row blocks ordered
    # [kh=0 (h-1), kh=1 (h), kh=2 (h+1)]; grouped conv => block-diagonal within each
    cg = ch // groups
    w2s = jnp.zeros((3 * chpad, chpad), jnp.float32)
    for kh in range(3):
        for gi in range(groups):
            blk = raw["w2"][gi * cg:(gi + 1) * cg, :, kh, 0]        # (cg_out, cg_in)
            w2s = w2s.at[kh * chpad + gi * cg: kh * chpad + (gi + 1) * cg,
                         gi * cg:(gi + 1) * cg].set(blk)

    # stage 2b: depthwise taps (chpad, 3); BN2 (which follows both convs) folded here
    wdwf = jnp.zeros((chpad, 3), jnp.float32)
    wdwf = wdwf.at[:ch].set(s2[:, None] * raw["wdw"][:, 0, 0, :])

    # stage 3: (c, chpad), BN3 scale folded into rows, padding columns zero
    w3f = jnp.zeros((c, chpad), jnp.float32)
    w3f = w3f.at[:, :ch].set(s3[:, None] * dense_1x1(raw["w3"], ch, c, cgroups))

    # packed biases: col0 = b1 (padded), col1 = b2 (padded), col2 = b3
    brows = max(c, chpad)
    bias = jnp.zeros((brows, 3), jnp.float32)
    bias = bias.at[:ch, 0].set(b1).at[:ch, 1].set(b2).at[:c, 2].set(b3)

    return {"w1": w1f, "w2": w2s, "wdw": wdwf, "w3": w3f, "bias": bias}


# ---------------- plain-JAX reference (mirrors the PyTorch NCHW forward) ----------------

def torch_reference(x_nchw, raw, groups, cgroups):
    def conv(x, w, pad, g):
        return jax.lax.conv_general_dilated(
            x, w, window_strides=(1, 1),
            padding=[(pad[0], pad[0]), (pad[1], pad[1])],
            dimension_numbers=("NCHW", "OIHW", "NCHW"),
            feature_group_count=g, precision=jax.lax.Precision.HIGHEST)

    def bn_relu(x, stats):
        gamma, beta, mean, var = stats
        y = (x - mean[None, :, None, None]) / jnp.sqrt(var[None, :, None, None] + EPS)
        y = y * gamma[None, :, None, None] + beta[None, :, None, None]
        return jnp.maximum(y, 0.0)

    ch = raw["w1"].shape[0]
    h = bn_relu(conv(x_nchw, raw["w1"], (0, 0), cgroups), raw["bn1"])
    h = conv(h, raw["w2"], (1, 0), groups)
    h = conv(h, raw["wdw"], (0, 1), ch)
    h = bn_relu(h, raw["bn2"])
    h = bn_relu(conv(h, raw["w3"], (0, 0), cgroups), raw["bn3"])
    return h + x_nchw


if __name__ == "__main__":
    N, C, H, W = 2, 8, 16, 16          # c=8 -> c//2=4, divisible by groups
    groups, cgroups = 2, 1

    key = jax.random.PRNGKey(0)
    kx, kw = jax.random.split(key)
    x = jax.random.normal(kx, (N, C, H, W), jnp.float32)

    raw = init_raw_params(kw, C, groups, cgroups)
    kparams = to_kernel_params(raw, C, groups, cgroups)

    out = resnext_forward(x, kparams)
    out = jax.block_until_ready(out)

    ref = torch_reference(x, raw, groups, cgroups)
    assert out.shape == (N, C, H, W)
    max_err = float(jnp.max(jnp.abs(out - ref)))
    assert jnp.allclose(out, ref, rtol=2e-2, atol=2e-2), f"max_err={max_err}"

    print("KERNEL_OK")
</pallas_src>

<mosaic_0001>
module attributes {stable_mosaic.version = 11 : i64} {
  func.func @resnext_kernel(%arg0: i32, %arg1: memref<8x256xf32, #tpu.memory_space<vmem>>, %arg2: memref<8x8xf32, #tpu.memory_space<vmem>>, %arg3: memref<24x8xf32, #tpu.memory_space<vmem>>, %arg4: memref<8x3xf32, #tpu.memory_space<vmem>>, %arg5: memref<8x8xf32, #tpu.memory_space<vmem>>, %arg6: memref<8x3xf32, #tpu.memory_space<vmem>>, %arg7: memref<4x8x256xf32, #tpu.memory_space<vmem>>, %arg8: memref<8x256xf32, #tpu.memory_space<vmem>>) attributes {dimension_semantics = [#tpu.dimension_semantics<parallel>], iteration_bounds = array<i64: 2>, scalar_prefetch = 0 : i64, scratch_operands = 0 : i64, tpu.core_type = #tpu.core_type<tc>, window_params = [{transform_indices = @transform_0, window_bounds = array<i64: 8, 256>}, {pipeline_mode = #tpu.pipeline_mode<synchronous>, transform_indices = @transform_1, window_bounds = array<i64: 8, 8>}, {pipeline_mode = #tpu.pipeline_mode<synchronous>, transform_indices = @transform_2, window_bounds = array<i64: 24, 8>}, {pipeline_mode = #tpu.pipeline_mode<synchronous>, transform_indices = @transform_3, window_bounds = array<i64: 8, 3>}, {pipeline_mode = #tpu.pipeline_mode<synchronous>, transform_indices = @transform_4, window_bounds = array<i64: 8, 8>}, {pipeline_mode = #tpu.pipeline_mode<synchronous>, transform_indices = @transform_5, window_bounds = array<i64: 8, 3>}, {pipeline_mode = #tpu.pipeline_mode<synchronous>, transform_indices = @transform_6, window_bounds = array<i64: 4, 8, 256>}, {transform_indices = @transform_7, window_bounds = array<i64: 8, 256>}]} {
    %c0 = arith.constant 0 : index
    %c0_0 = arith.constant 0 : index
    %0 = vector.load %arg1[%c0, %c0_0] : memref<8x256xf32, #tpu.memory_space<vmem>>, vector<8x256xf32>
    %c0_1 = arith.constant 0 : index
    %c0_2 = arith.constant 0 : index
    %1 = vector.load %arg6[%c0_1, %c0_2] : memref<8x3xf32, #tpu.memory_space<vmem>>, vector<8x1xf32>
    %c0_3 = arith.constant 0 : index
    %c1 = arith.constant 1 : index
    %2 = vector.load %arg6[%c0_3, %c1] : memref<8x3xf32, #tpu.memory_space<vmem>>, vector<8x1xf32>
    %c0_4 = arith.constant 0 : index
    %c2 = arith.constant 2 : index
    %3 = vector.load %arg6[%c0_4, %c2] : memref<8x3xf32, #tpu.memory_space<vmem>>, vector<8x1xf32>
    %c0_5 = arith.constant 0 : index
    %c0_6 = arith.constant 0 : index
    %4 = vector.load %arg2[%c0_5, %c0_6] : memref<8x8xf32, #tpu.memory_space<vmem>>, vector<8x8xf32>
    %cst = arith.constant dense<0.000000e+00> : vector<8x256xf32>
    %5 = tpu.matmul %4, %0, %cst {dimension_numbers = #tpu.dot_dimension_numbers<[1], [0], [0], [1], [0, 0, 1, 1], [], []>} : vector<8x8xf32>, vector<8x256xf32>, vector<8x256xf32> -> vector<8x256xf32>
    %6 = vector.broadcast %1 : vector<8x1xf32> to vector<8x256xf32>
    %7 = arith.addf %5, %6 : vector<8x256xf32>
    %cst_7 = arith.constant 0.000000e+00 : f32
    %8 = vector.broadcast %cst_7 : f32 to vector<8x256xf32>
    %9 = arith.maximumf %7, %8 : vector<8x256xf32>
    %c0_8 = arith.constant 0 : index
    %c0_9 = arith.constant 0 : index
    %c0_10 = arith.constant 0 : index
    %10 = vector.load %arg7[%c0_8, %c0_9, %c0_10] : memref<4x8x256xf32, #tpu.memory_space<vmem>>, vector<1x8x256xf32>
    %11 = vector.shape_cast %10 : vector<1x8x256xf32> to vector<8x256xf32>
    %c16_i32 = arith.constant 16 : i32
    %12 = tpu.dynamic_rotate %9 by %c16_i32 dim 1 : vector<8x256xf32>, i32 -> vector<8x256xf32>
    %13 = arith.mulf %11, %12 : vector<8x256xf32>
    %c1_11 = arith.constant 1 : index
    %c0_12 = arith.constant 0 : index
    %c0_13 = arith.constant 0 : index
    %14 = vector.load %arg7[%c1_11, %c0_12, %c0_13] : memref<4x8x256xf32, #tpu.memory_space<vmem>>, vector<1x8x256xf32>
    %15 = vector.shape_cast %14 : vector<1x8x256xf32> to vector<8x256xf32>
    %c240_i32 = arith.constant 240 : i32
    %16 = tpu.dynamic_rotate %9 by %c240_i32 dim 1 : vector<8x256xf32>, i32 -> vector<8x256xf32>
    %17 = arith.mulf %15, %16 : vector<8x256xf32>
    %c0_14 = arith.constant 0 : index
    %c0_15 = arith.constant 0 : index
    %18 = vector.load %arg3[%c0_14, %c0_15] : memref<24x8xf32, #tpu.memory_space<vmem>>, vector<8x8xf32>
    %cst_16 = arith.constant dense<0.000000e+00> : vector<8x256xf32>
    %19 = tpu.matmul %18, %13, %cst_16 {dimension_numbers = #tpu.dot_dimension_numbers<[1], [0], [0], [1], [0, 0, 1, 1], [], []>} : vector<8x8xf32>, vector<8x256xf32>, vector<8x256xf32> -> vector<8x256xf32>
    %c8 = arith.constant 8 : index
    %c0_17 = arith.constant 0 : index
    %20 = vector.load %arg3[%c8, %c0_17] : memref<24x8xf32, #tpu.memory_space<vmem>>, vector<8x8xf32>
    %cst_18 = arith.constant dense<0.000000e+00> : vector<8x256xf32>
    %21 = tpu.matmul %20, %9, %cst_18 {dimension_numbers = #tpu.dot_dimension_numbers<[1], [0], [0], [1], [0, 0, 1, 1], [], []>} : vector<8x8xf32>, vector<8x256xf32>, vector<8x256xf32> -> vector<8x256xf32>
    %22 = arith.addf %19, %21 : vector<8x256xf32>
    %c16 = arith.constant 16 : index
    %c0_19 = arith.constant 0 : index
    %23 = vector.load %arg3[%c16, %c0_19] : memref<24x8xf32, #tpu.memory_space<vmem>>, vector<8x8xf32>
    %cst_20 = arith.constant dense<0.000000e+00> : vector<8x256xf32>
    %24 = tpu.matmul %23, %17, %cst_20 {dimension_numbers = #tpu.dot_dimension_numbers<[1], [0], [0], [1], [0, 0, 1, 1], [], []>} : vector<8x8xf32>, vector<8x256xf32>, vector<8x256xf32> -> vector<8x256xf32>
    %25 = arith.addf %22, %24 : vector<8x256xf32>
    %c2_21 = arith.constant 2 : index
    %c0_22 = arith.constant 0 : index
    %c0_23 = arith.constant 0 : index
    %26 = vector.load %arg7[%c2_21, %c0_22, %c0_23] : memref<4x8x256xf32, #tpu.memory_space<vmem>>, vector<1x8x256xf32>
    %27 = vector.shape_cast %26 : vector<1x8x256xf32> to vector<8x256xf32>
    %c1_i32 = arith.constant 1 : i32
    %28 = tpu.dynamic_rotate %25 by %c1_i32 dim 1 : vector<8x256xf32>, i32 -> vector<8x256xf32>
    %29 = arith.mulf %27, %28 : vector<8x256xf32>
    %c3 = arith.constant 3 : index
    %c0_24 = arith.constant 0 : index
    %c0_25 = arith.constant 0 : index
    %30 = vector.load %arg7[%c3, %c0_24, %c0_25] : memref<4x8x256xf32, #tpu.memory_space<vmem>>, vector<1x8x256xf32>
    %31 = vector.shape_cast %30 : vector<1x8x256xf32> to vector<8x256xf32>
    %c255_i32 = arith.constant 255 : i32
    %32 = tpu.dynamic_rotate %25 by %c255_i32 dim 1 : vector<8x256xf32>, i32 -> vector<8x256xf32>
    %33 = arith.mulf %31, %32 : vector<8x256xf32>
    %c0_26 = arith.constant 0 : index
    %c0_27 = arith.constant 0 : index
    %34 = vector.load %arg4[%c0_26, %c0_27] : memref<8x3xf32, #tpu.memory_space<vmem>>, vector<8x1xf32>
    %35 = vector.broadcast %34 : vector<8x1xf32> to vector<8x256xf32>
    %36 = arith.mulf %35, %29 : vector<8x256xf32>
    %c0_28 = arith.constant 0 : index
    %c1_29 = arith.constant 1 : index
    %37 = vector.load %arg4[%c0_28, %c1_29] : memref<8x3xf32, #tpu.memory_space<vmem>>, vector<8x1xf32>
    %38 = vector.broadcast %37 : vector<8x1xf32> to vector<8x256xf32>
    %39 = arith.mulf %38, %25 : vector<8x256xf32>
    %40 = arith.addf %36, %39 : vector<8x256xf32>
    %c0_30 = arith.constant 0 : index
    %c2_31 = arith.constant 2 : index
    %41 = vector.load %arg4[%c0_30, %c2_31] : memref<8x3xf32, #tpu.memory_space<vmem>>, vector<8x1xf32>
    %42 = vector.broadcast %41 : vector<8x1xf32> to vector<8x256xf32>
    %43 = arith.mulf %42, %33 : vector<8x256xf32>
    %44 = arith.addf %40, %43 : vector<8x256xf32>
    %45 = vector.broadcast %2 : vector<8x1xf32> to vector<8x256xf32>
    %46 = arith.addf %44, %45 : vector<8x256xf32>
    %cst_32 = arith.constant 0.000000e+00 : f32
    %47 = vector.broadcast %cst_32 : f32 to vector<8x256xf32>
    %48 = arith.maximumf %46, %47 : vector<8x256xf32>
    %c0_33 = arith.constant 0 : index
    %c0_34 = arith.constant 0 : index
    %49 = vector.load %arg5[%c0_33, %c0_34] : memref<8x8xf32, #tpu.memory_space<vmem>>, vector<8x8xf32>
    %cst_35 = arith.constant dense<0.000000e+00> : vector<8x256xf32>
    %50 = tpu.matmul %49, %48, %cst_35 {dimension_numbers = #tpu.dot_dimension_numbers<[1], [0], [0], [1], [0, 0, 1, 1], [], []>} : vector<8x8xf32>, vector<8x256xf32>, vector<8x256xf32> -> vector<8x256xf32>
    %51 = vector.broadcast %3 : vector<8x1xf32> to vector<8x256xf32>
    %52 = arith.addf %50, %51 : vector<8x256xf32>
    %cst_36 = arith.constant 0.000000e+00 : f32
    %53 = vector.broadcast %cst_36 : f32 to vector<8x256xf32>
    %54 = arith.maximumf %52, %53 : vector<8x256xf32>
    %55 = arith.addf %54, %0 : vector<8x256xf32>
    %c0_37 = arith.constant 0 : index
    %c0_38 = arith.constant 0 : index
    %56 = vector.load %arg8[%c0_37, %c0_38] : memref<8x256xf32, #tpu.memory_space<vmem>>, vector<8x256xf32>
    tpu.vector_store %arg8[%c0_37, %c0_38], %55 {strides = array<i32>} : memref<8x256xf32, #tpu.memory_space<vmem>>, vector<8x256xf32>,
    return
  }
  func.func @transform_0(%arg0: i32) -> (i32, i32) {
    %c0_i32 = arith.constant 0 : i32
    %c0_i32_0 = arith.constant 0 : i32
    return %c0_i32, %arg0 : i32, i32
  }
  func.func @transform_1(%arg0: i32) -> (i32, i32) {
    %c0_i32 = arith.constant 0 : i32
    %c0_i32_0 = arith.constant 0 : i32
    %c0_i32_1 = arith.constant 0 : i32
    return %c0_i32, %c0_i32_0 : i32, i32
  }
  func.func @transform_2(%arg0: i32) -> (i32, i32) {
    %c0_i32 = arith.constant 0 : i32
    %c0_i32_0 = arith.constant 0 : i32
    %c0_i32_1 = arith.constant 0 : i32
    return %c0_i32, %c0_i32_0 : i32, i32
  }
  func.func @transform_3(%arg0: i32) -> (i32, i32) {
    %c0_i32 = arith.constant 0 : i32
    %c0_i32_0 = arith.constant 0 : i32
    %c0_i32_1 = arith.constant 0 : i32
    return %c0_i32, %c0_i32_0 : i32, i32
  }
  func.func @transform_4(%arg0: i32) -> (i32, i32) {
    %c0_i32 = arith.constant 0 : i32
    %c0_i32_0 = arith.constant 0 : i32
    %c0_i32_1 = arith.constant 0 : i32
    return %c0_i32, %c0_i32_0 : i32, i32
  }
  func.func @transform_5(%arg0: i32) -> (i32, i32) {
    %c0_i32 = arith.constant 0 : i32
    %c0_i32_0 = arith.constant 0 : i32
    %c0_i32_1 = arith.constant 0 : i32
    return %c0_i32, %c0_i32_0 : i32, i32
  }
  func.func @transform_6(%arg0: i32) -> (i32, i32, i32) {
    %c0_i32 = arith.constant 0 : i32
    %c0_i32_0 = arith.constant 0 : i32
    %c0_i32_1 = arith.constant 0 : i32
    %c0_i32_2 = arith.constant 0 : i32
    return %c0_i32, %c0_i32_0, %c0_i32_1 : i32, i32, i32
  }
  func.func @transform_7(%arg0: i32) -> (i32, i32) {
    %c0_i32 = arith.constant 0 : i32
    %c0_i32_0 = arith.constant 0 : i32
    return %c0_i32, %arg0 : i32, i32
  }
}

</mosaic_0001>

<bundles_post_ra>
// kernel: tpu_custom_call.1
= control target key start
LH: loop header
LB: loop body
LE: loop exit
PB: predicated region body
PF: predicated region fallthrough
CT: control target
= control target key end

     0   :  { %12 = vsyncpa [#allocation3], 0  ;;  %s1439_s0 = inlined_call_operand.hbm [shape: f32[8,512], index: 0, kind: input, shape index: {}]   ;;  %s1440_s1 = inlined_call_operand.vmem [shape: f32[8,8], index: 1, kind: input, shape index: {}]   ;;  %s1441_s2 = inlined_call_operand.vmem [shape: f32[24,8], index: 2, kind: input, shape index: {}]   ;;  %s1442_s3 = inlined_call_operand.vmem [shape: f32[8,3], index: 3, kind: input, shape index: {}]   ;;  %s1443_s4 = inlined_call_operand.hbm [shape: f32[8,8], index: 4, kind: input, shape index: {}]   ;;  %s1444_s5 = inlined_call_operand.vmem [shape: f32[8,3], index: 5, kind: input, shape index: {}]   ;;  %s1445_s6 = inlined_call_operand.vmem [shape: f32[4,8,256], index: 6, kind: input, shape index: {}]   ;;  %s1446_s7 = inlined_call_operand.hbm [shape: f32[8,512], index: 7, kind: output, shape index: {}]  }
   0x1   :  { %14 = vsyncpa [#allocation3 + $0x1], 0 }
   0x2   :  { %15 = vsyncpa [#allocation6], 0 }
   0x3   :  { %16 = vsyncpa [#allocation4], 0 }
   0x4   :  { %18 = vsyncpa [#allocation4 + $0x1], 0  ;;  %s1169_s24 = smov 0   ;;  %s1171_s25 = smov 0  }
   0x5   :  { %s1173_s26 = smov 0   ;;  %s1175_s27 = smov 0  }
   0x6 LB: > { %s1190_s28 = sadd.s32 4294967295, %s1116_s27   ;;  %s884_s29 = sadd.s32 4294967294, %s1116_s27   ;;  %s1116_s27 = sphi %s1175_s27, %s1470_s27   ;;  %s1112_s26 = sphi %s1173_s26, %s1469_s26   ;;  %s1108_s25 = sphi %s1171_s25, %s1468_s25   ;;  %s1104_s24 = sphi %s1169_s24, %s1467_s24  }
   0x7   : > { %p44_p0 = scmp.ne.s32.totalorder %s1108_s25, %s1104_s24  ;;  %p1447_p1 = scmp.eq.s32.totalorder %s1190_s28, 0 }
   0x8   : > { %p200_p3 = scmp.eq.s32.totalorder %s884_s29, 1  ;;  %p885_p5 = scmp.ge.s32.totalorder %s1116_s27, 1 }
   0x9   : > { %p1199_p4 = por %p1447_p1, %p44_p0  ;;  %p207_p7 = scmp.lt.s32.totalorder %s1116_s27, 3 }
   0xa   : > { %p1204_p6 = por %p200_p3, %p44_p0  ;;  %s1118_s10 = smov [#allocation5]  }
   0xb   : > { %s1450_s30 = scalar_select %p1199_p4, 1, 0 }
   0xc   : > { %s1451_s8 = scalar_select %p1204_p6, 1, 0 }
   0xd   : > { %p1209_p8 = pnand %p885_p5, %p207_p7  ;;  %s229_s11 = sshll.u32 %s1118_s10, 4  ;;  %s230_s11 = int_to_ptr.vmem [resolvable:$true] %s229_s11 }
   0xe   : > { %s1217_s12 = sadd.s32 1, %s1116_s27   ;;  %s31_s16 = sadd.s32 1, %s1112_s26 }
   0xf   : > { %s1452_s9 = scalar_select %p1209_p8, 1, 0 }
  0x10   : > { %p925_p10 = pneg %p1209_p8  ;;  %s28_s14 = ssub.s32 %s1116_s27, %s1217_s12 }
  0x11   : > { %p1227_p12 = scmp.eq.s32.totalorder %s28_s14, 0  ;;  %s988_s19 = scalar_lea.hbm %s1443_s4, 128 }
  0x12   : > { %p1221_p11 = pnand %p925_p10, %p1447_p1  ;;  %p989_p0 = scmp.ne.s32.totalorder %s1443_s4, %s988_s19 }
  0x13   : > { %s1454_s15 = scalar_select %p1227_p12, 1, 0 }
  0x14   : > { %p990_p3 = pneg %p1221_p11  ;;  %p995_p10 = scmp.lt.u32.totalorder %s988_s19, %s1443_s4 }
  0x16   : > { %p991_p5 = pnand %p990_p3, %p989_p0 }
  0x18   : > { %p992_p7 = pneg %p991_p5 }
  0x1a   : > { %p997_p9 = pnand %p995_p10, %p992_p7 }
  0x1c   : > { %1000 = shalt.err (!%p997_p9)
}
  0x1d   : > { %s1001_s29 = scalar_lea.vmem %s230_s11, 128  ;;  %p1009_p6 = scmp.lt.s32.totalorder %s230_s11, %s230_s11 }
  0x1e   : > { %p1002_p1 = scmp.ne.s32.totalorder %s230_s11, %s1001_s29  ;;  %p1010_p4 = scmp.lt.s32.totalorder %s1001_s29, %s1001_s29 }
  0x20   : > { %p1004_p2 = pnand %p1002_p1, %p990_p3  ;;  %p1011_p8 = por %p1010_p4, %p1009_p6 }
  0x22   : > { %p1005_p13 = pneg %p1004_p2 }
  0x24   : > { %p1012_p12 = pnand %p1011_p8, %p1005_p13 }
  0x26   : > { %1015 = shalt.err (!%p1012_p12)
}
  0x27   : > { %928 = dma.hbm_to_vmem [thread:$0]  (!%p1221_p11), %s1443_s4, 128, %s230_s11, [#allocation6]  }
  0x28   : > { %p1455_p1 = scmp.ne.s32.totalorder %s1454_s15, 0  ;;  %p39_p2 = scmp.eq.s32.totalorder %s1116_s27, 0 }
  0x29   : > { %p1456_p4 = scmp.ne.s32.totalorder %s1112_s26, %s1108_s25  ;;  %p1457_p6 = scmp.eq.s32.totalorder %s1190_s28, 1 }
  0x2a   : > { %s1253_s17 = scalar_select %p1455_p1, %s1112_s26, %s31_s16  }
  0x2b   : > { %p1261_p8 = por %p1457_p6, %p1456_p4  ;;  %p938_p9 = scmp.lt.s32.totalorder %s1116_s27, 2 }
  0x2c   : > { %s246_s18 = sand.u32 1, %s1112_s26   ;;  %p1459_p12 = pmov %p1456_p4 }
  0x2d   : > { %s888_s19 = sshll.u32 %s246_s18, 4  ;;  %s911_s20 = sshll.u32 %s1116_s27, 8 }
  0x2e   : > { %p40_p13 = por %p39_p2, %p1459_p12  ;;  %s1274_s11 = scalar_lea.hbm %s1439_s0, %s911_s20 }
  0x2f   : > { %s250_s15 = scalar_lea.vmem [#allocation2], %s888_s19  ;;  %s247_s29 = scalar_lea.sflag [#allocation3], %s246_s18 }
  0x30   : > { %s258_s16 = sshll.u32 %s250_s15, 4  ;;  %p1276_p11 = pnand %p938_p9, %p40_p13  ;;  %s1280_s16 = int_to_ptr.vmem [resolvable:$true] %s258_s16 }
  0x31   : > { %s1016_s10 = scalar_lea.hbm %s1274_s11, 256  ;;  %s1021_s20 = scalar_lea.hbm %s1439_s0, 512 }
  0x32   : > { %p1017_p0 = scmp.ne.s32.totalorder %s1274_s11, %s1016_s10  ;;  %p1018_p3 = pneg %p1276_p11 }
  0x33   : > { %p1022_p10 = scmp.lt.u32.totalorder %s1274_s11, %s1439_s0  ;;  %p1023_p1 = scmp.lt.u32.totalorder %s1021_s20, %s1016_s10 }
  0x34   : > { %p1019_p5 = pnand %p1018_p3, %p1017_p0  ;;  %p1025_p4 = scmp.lt.u32.totalorder %s1016_s10, %s1274_s11 }
  0x35   : > { %p1024_p2 = por %p1023_p1, %p1022_p10 }
  0x36   : > { %p1020_p7 = pneg %p1019_p5 }
  0x37   : > { %p1026_p6 = por %p1025_p4, %p1024_p2 }
  0x39   : > { %p1027_p9 = pnand %p1026_p6, %p1020_p7 }
  0x3b   : > { %1030 = shalt.err (!%p1027_p9)
}
  0x3c   : > { %s1031_s18 = scalar_lea.vmem %s1280_s16, 256  ;;  %s1119_s15 = smov [#allocation2]  }
  0x3d   : > { %p1032_p12 = scmp.ne.s32.totalorder %s1280_s16, %s1031_s18  ;;  %s1036_s14 = sshll.u32 %s1119_s15, 4  ;;  %s1037_s14 = int_to_ptr.vmem [resolvable:$false] %s1036_s14 }
  0x3e   : > { %s1038_s19 = scalar_lea.vmem %s1037_s14, 512  ;;  %p1039_p5 = scmp.lt.s32.totalorder %s1280_s16, %s1037_s14 }
  0x3f   : > { %p1034_p13 = pnand %p1032_p12, %p1018_p3  ;;  %p1040_p10 = scmp.lt.s32.totalorder %s1038_s19, %s1031_s18 }
  0x41   : > { %p1035_p0 = pneg %p1034_p13  ;;  %p1041_p1 = por %p1040_p10, %p1039_p5 }
  0x43   : > { %p1042_p2 = pnand %p1041_p1, %p1035_p0 }
  0x45   : > { %1045 = shalt.err (!%p1042_p2)
}
  0x46   : > { %932 = dma.hbm_to_vmem [thread:$0]  (!%p1276_p11), %s1274_s11, 256, %s1280_s16, %s247_s29  }
  0x47   : > { %p1461_p7 = scmp.ne.s32.totalorder %s1452_s9, 0 }
  0x48   : > { %s1310_s10 = sand.u32 (!%p1461_p7), 1, %s1108_s25   ;;  %p1462_p3 = scmp.ne.s32.totalorder (!%p1461_p7), %s1450_s30, 0 }
  0x49   : > { %267 = sbr.rel (%p1461_p7) target bundleno = 1021 (0x3fd), region = 48  ;;  %s892_s20 = sshll.u32 (!%p1461_p7), %s1310_s10, 4 }
  0x4a   : > { %s270_s21 = scalar_lea.sflag (!%p1461_p7), [#allocation3], %s1310_s10  ;;  %s273_s22 = scalar_lea.vmem (!%p1461_p7), [#allocation2], %s892_s20 }
  0x50   : > { %1091 = dma.done.wait (%p1462_p3), %s270_s21, 256  }
  0x51   : > { %1093 = vsyncadd (%p1462_p3), %s270_s21, 4294967040  ;;  %p1463_p11 = scmp.eq.s32.totalorder %s1190_s28, 0 }
  0x53   : > { %1095 = dma.done.wait (%p1463_p11), [#allocation6], 128   ;;  %p1464_p4 = pmov %p1463_p11 }
  0x54   : > { %v1120_v0 = vmov 0.0   ;;  %v1121_v1 = vmov 0   ;;  %v1326_v2 = vld [vmem:[%s273_s22 + $0x8] sm:$0xff]  ;;  %v1328_v3 = vld [vmem:[%s273_s22] sm:$0xff]  ;;  %vm319_vm0 = vcmask 64512   ;;  %s1122_s23 = smov 16   ;;  %v402_v17 = vlaneseq }
  0x55   : > { %1097 = vsyncadd (%p1464_p4), [#allocation6], 4294967168  ;;  %387 = vmatprep.mubr.f32.mxu0 %v1120_v0  ;;  %982 = vset.pattern.permute.xlu0 %v1121_v1  ;;  %v313_v4 = vld [vmem:[%s1440_s1] sm:$0xff]  ;;  %v422_v13 = vld [vmem:[%s1441_s2 + $0x8] sm:$0xff]  ;;  %v1123_v14 = vmov 1   ;;  %s1124_s15 = smov 112  }
  0x56   : > { %490 = vmatprep.mubr.f32.mxu1 %v1120_v0  ;;  %983 = vset.pattern.permute.xlu1 %v1121_v1  ;;  %v1337_v5 = vld [vmem:[%s1444_s5] sm:$0xff]  ;;  %v1125_v16 = vmov 2   ;;  %v403_v18 = vand.u32 127, %v402_v17  ;;  %v397_v21 = vld [vmem:[%s1445_s6 + $0x8] sm:$0xff]  ;;  %v896_v28 = vld [vmem:[%s1445_s6 + $0x10] sm:$0xff]  ;;  %s1126_s21 = smov 1  }
  0x57   : > { %323 = vmatprep.subr.mxu0 %v1326_v2  ;;  %316 = vperm.xlu0 %982, %v1337_v5   ;;  %v672_v15 = vld [vmem:[%s1442_s3] sm:$0xff]  ;;  %v897_v29 = vld [vmem:[%s1445_s6 + $0x18] sm:$0xff]  ;;  %v571_v36 = vld [vmem:[%s1441_s2 + $0x10] sm:$0xff]  ;;  %s1127_s22 = smov 127   ;;  %s912_s14 = sshll.u32 %s1190_s28, 8 }
  0x58   : > { %324 = vmatpush1.msra.mxu0 %v1328_v3  ;;  %vm404_vm1 = vcmp.lt.s32.totalorder %v403_v18, 16  ;;  %v396_v20 = vld [vmem:[%s1445_s6] sm:$0xff]  ;;  %vm416_vm2 = vcmp.lt.s32.totalorder %v403_v18, 112  ;;  %vm655_vm3 = vcmp.lt.s32.totalorder %v403_v18, 1  ;;  %vm667_vm4 = vcmp.lt.s32.totalorder %v403_v18, 127  ;;  %v902_v47 = vld [vmem:[%s1445_s6 + $0x28] sm:$0xff]  ;;  %s1395_s9 = scalar_lea.hbm %s1446_s7, %s912_s14 }
  0x59   : > { %895 = vmatmul.mubr.msk.f32.vlgmr.msra.gmra.mrb[0].mxu0 %vm319_vm0, %v313_v4  ;;  %v421_v30 = vld [vmem:[%s1441_s2] sm:$0xff]  ;;  %v903_v50 = vld [vmem:[%s1445_s6 + $0x30] sm:$0xff]  ;;  %v904_v51 = vld [vmem:[%s1445_s6 + $0x38] sm:$0xff]  ;;  %s307_s19 = scalar_lea.vmem [#allocation7], %s892_s20  ;;  %s790_s28 = scalar_lea.sflag [#allocation4], %s1310_s10 }
  0x5a   : > { %776 = vmatprep.mubr.f32.mxu0 %v1120_v0  ;;  %v901_v46 = vld [vmem:[%s1445_s6 + $0x20] sm:$0xff]  ;;  %s1128_s11 = smov [#allocation7]  }
  0x5b   : > { %984 = vset.pattern.permute.xlu0 %v1123_v14  ;;  %s1050_s16 = sshll.u32 %s1128_s11, 4  ;;  %s1051_s16 = int_to_ptr.vmem [resolvable:$false] %s1050_s16 }
  0xd6   : > { %v317_v6 = vpop.permute.xlu0 %316 }
 0x12c   : > { %v389_v7 = vpop.f32.mrb[0].mxu0 }
 0x12d   : > { %v390_v8 = vadd.f32 %v389_v7, %v317_v6  ;;  %v391_v9 = vpop.f32.mrb[1].mxu0 }
 0x12e   : > { %v392_v10 = vadd.f32 %v391_v9, %v317_v6 }
 0x12f   : > { %v394_v11 = vmax.f32 %v390_v8, 0.0 }
 0x130   : > { %v395_v12 = vmax.f32 %v392_v10, 0.0 }
 0x131   : > { %398 = vrot.lane.b32.xlu0 %v394_v11, %s1122_s23 }
 0x132   : > { %400 = vrot.lane.b32.xlu1 %v395_v12, %s1122_s23  ;;  %426 = vmatprep.subr.mxu1 %v395_v12  ;;  %s1052_s23 = scalar_lea.vmem %s1051_s16, 512 }
 0x133   : > { %427 = vmatpush1.msra.mxu1 %v394_v11 }
 0x134   : > { %898 = vmatmul.mubr.msk.f32.vlgmr.msra.gmra.mrb[0].mxu1 %vm319_vm0, %v422_v13 }
 0x135   : > { %414 = vrot.lane.b32.xlu0 %v395_v12, %s1124_s15  ;;  %564 = vmatprep.mubr.f32.mxu1 %v1120_v0 }
 0x136   : > { %412 = vrot.lane.b32.xlu1 %v394_v11, %s1124_s15  ;;  %v704_v11 = vld [vmem:[#allocation5] sm:$0xff] }
 0x139   : > { %681 = vperm.xlu0 %984, %v672_v15  }
 0x13a   : > { %675 = vperm.xlu1 %983, %v672_v15  }
 0x13d   : > { %987 = vset.pattern.permute.xlu0 %v1125_v16 }
 0x13e   : > { %985 = vset.pattern.permute.xlu1 %v1125_v16 }
 0x13f   : > { %689 = vperm.xlu1 %985, %v672_v15  }
 0x143   : > { %986 = vset.pattern.permute.xlu1 %v1123_v14 }
 0x1a3   : > { %v399_v19 = vpop.permute.xlu0 %398 }
 0x1a4   : > { %v401_v22 = vpop.permute.xlu1 %400 }
 0x1a5   : > { %v405_v23 = vsel %vm404_vm1, %v399_v19, %v401_v22  ;;  %v406_v24 = vsel %vm404_vm1, %v401_v22, %v399_v19 }
 0x1a6   : > { %v407_v25 = vmul.f32 %v406_v24, %v396_v20  ;;  %v408_v26 = vmul.f32 %v405_v23, %v397_v21 }
 0x1a7   : > { %v415_v27 = vpop.permute.xlu0 %414 }
 0x1a8   : > { %v413_v31 = vpop.permute.xlu1 %412  ;;  %500 = vmatprep.subr.mxu1 %v408_v26 }
 0x1a9   : > { %v417_v32 = vsel %vm416_vm2, %v413_v31, %v415_v27  ;;  %v418_v33 = vsel %vm416_vm2, %v415_v27, %v413_v31  ;;  %501 = vmatpush1.msra.mxu1 %v407_v25 }
 0x1aa   : > { %v419_v34 = vmul.f32 %v896_v28, %v417_v32  ;;  %v420_v35 = vmul.f32 %v897_v29, %v418_v33  ;;  %899 = vmatmul.mubr.msk.f32.vlgmr.msra.gmra.mrb[0].mxu1 %vm319_vm0, %v421_v30 }
 0x1ab   : > { %639 = vmatprep.mubr.f32.mxu1 %v1120_v0 }
 0x1ac   : > { %575 = vmatprep.subr.mxu1 %v420_v35 }
 0x1ad   : > { %576 = vmatpush1.msra.mxu1 %v419_v34 }
 0x1b2   : > { %900 = vmatmul.mubr.msk.f32.vlgmr.msra.gmra.mrb[0].mxu1 %vm319_vm0, %v571_v36 }
 0x1b8   : > { %v682_v41 = vpop.permute.xlu0 %681 }
 0x1b9   : > { %v676_v39 = vpop.permute.xlu1 %675 }
 0x1be   : > { %v690_v40 = vpop.permute.xlu1 %689 }
 0x285   : > { %v641_v37 = vpop.f32.mrb[0].mxu1 }
 0x286   : > { %651 = vrot.lane.b32.xlu1 %v641_v37, %s1126_s21  ;;  %v643_v38 = vpop.f32.mrb[1].mxu1  ;;  %v684_v60 = vmul.f32 %v682_v41, %v641_v37 }
 0x287   : > { %653 = vrot.lane.b32.xlu0 %v643_v38, %s1126_s21  ;;  %v685_v61 = vmul.f32 %v682_v41, %v643_v38  ;;  %s804_s21 = sshll.u32 %s307_s19, 4  ;;  %s1397_s21 = int_to_ptr.vmem [resolvable:$true] %s804_s21 }
 0x288   : > { %s1046_s20 = scalar_lea.vmem %s1397_s21, 256  ;;  %p1053_p13 = scmp.lt.s32.totalorder %s1397_s21, %s1051_s16 }
 0x289   : > { %p1047_p6 = scmp.ne.s32.totalorder %s1397_s21, %s1046_s20  ;;  %p1054_p0 = scmp.lt.s32.totalorder %s1052_s23, %s1046_s20 }
 0x28a   : > { %663 = vrot.lane.b32.xlu1 %v641_v37, %s1127_s22 }
 0x28b   : > { %665 = vrot.lane.b32.xlu0 %v643_v38, %s1127_s22  ;;  %p1048_p9 = pnand %p1047_p6, %p1261_p8  ;;  %p1055_p5 = por %p1054_p0, %p1053_p13 }
 0x28d   : > { %p1049_p12 = pneg %p1048_p9 }
 0x28e   : > { %697 = vperm.xlu1 %986, %v1337_v5  }
 0x28f   : > { %706 = vperm.xlu0 %987, %v1337_v5   ;;  %p1056_p10 = pnand %p1055_p5, %p1049_p12 }
 0x2f8   : > { %v652_v42 = vpop.permute.xlu1 %651 }
 0x2f9   : > { %v654_v43 = vpop.permute.xlu0 %653 }
 0x2fa   : > { %v656_v48 = vsel %vm655_vm3, %v652_v42, %v654_v43  ;;  %v657_v49 = vsel %vm655_vm3, %v654_v43, %v652_v42 }
 0x2fb   : > { %v658_v54 = vmul.f32 %v901_v46, %v657_v49  ;;  %v659_v55 = vmul.f32 %v902_v47, %v656_v48 }
 0x2fc   : > { %v664_v44 = vpop.permute.xlu1 %663 }
 0x2fd   : > { %v666_v45 = vpop.permute.xlu0 %665  ;;  %v678_v58 = vmul.f32 %v676_v39, %v658_v54  ;;  %v679_v59 = vmul.f32 %v676_v39, %v659_v55 }
 0x2fe   : > { %v668_v52 = vsel %vm667_vm4, %v664_v44, %v666_v45  ;;  %v669_v53 = vsel %vm667_vm4, %v666_v45, %v664_v44 }
 0x2ff   : > { %v670_v56 = vmul.f32 %v903_v50, %v668_v52  ;;  %v671_v57 = vmul.f32 %v904_v51, %v669_v53  ;;  %v686_v0 = vadd.f32 %v684_v60, %v678_v58  ;;  %v687_v1 = vadd.f32 %v685_v61, %v679_v59 }
 0x301   : > { %v692_v62 = vmul.f32 %v690_v40, %v670_v56  ;;  %v693_v63 = vmul.f32 %v690_v40, %v671_v57 }
 0x303   : > { %v694_v4 = vadd.f32 %v692_v62, %v686_v0  ;;  %v695_v5 = vadd.f32 %v693_v63, %v687_v1 }
 0x30d   : > { %v698_v6 = vpop.permute.xlu1 %697 }
 0x30e   : > { %v700_v7 = vadd.f32 %v698_v6, %v694_v4  ;;  %v701_v8 = vadd.f32 %v698_v6, %v695_v5  ;;  %v707_v12 = vpop.permute.xlu0 %706 }
 0x310   : > { %v702_v9 = vmax.f32 %v700_v7, 0.0  ;;  %v703_v10 = vmax.f32 %v701_v8, 0.0 }
 0x312   : > { %712 = vmatprep.subr.mxu0 %v703_v10 }
 0x313   : > { %713 = vmatpush1.msra.mxu0 %v702_v9 }
 0x314   : > { %905 = vmatmul.mubr.msk.f32.vlgmr.msra.gmra.mrb[2].mxu0 %vm319_vm0, %v704_v11 }
 0x3e7   : > { %v778_v13 = vpop.f32.mrb[2].mxu0 }
 0x3e8   : > { %v779_v14 = vadd.f32 %v778_v13, %v707_v12  ;;  %v780_v15 = vpop.f32.mrb[3].mxu0 }
 0x3e9   : > { %v781_v16 = vadd.f32 %v780_v15, %v707_v12 }
 0x3ea   : > { %v783_v17 = vmax.f32 %v779_v14, 0.0 }
 0x3eb   : > { %v784_v18 = vmax.f32 %v781_v16, 0.0 }
 0x3ec   : > { %v785_v19 = vadd.f32 %v783_v17, %v1328_v3 }
 0x3ed   : > { %v786_v20 = vadd.f32 %v784_v18, %v1326_v2 }
 0x3ee   : > { %787 = vst [vmem:[%s307_s19] sm:$0xff] %v785_v19 }
 0x3ef   : > { %788 = vst [vmem:[%s307_s19 + $0x8] sm:$0xff] %v786_v20 }
 0x3f0   : > { %1059 = shalt.err (!%p1056_p10)
}
 0x3f1   : > { %s1060_s10 = scalar_lea.hbm %s1395_s9, 256  ;;  %s1064_s15 = scalar_lea.hbm %s1446_s7, 512 }
 0x3f2   : > { %p1061_p1 = scmp.ne.s32.totalorder %s1395_s9, %s1060_s10  ;;  %p1065_p3 = scmp.lt.u32.totalorder %s1395_s9, %s1446_s7 }
 0x3f3   : > { %p1066_p11 = scmp.lt.u32.totalorder %s1064_s15, %s1060_s10  ;;  %p1068_p6 = scmp.lt.u32.totalorder %s1060_s10, %s1395_s9 }
 0x3f4   : > { %p1062_p2 = pnand %p1061_p1, %p1261_p8 }
 0x3f5   : > { %p1067_p4 = por %p1066_p11, %p1065_p3 }
 0x3f6   : > { %p1063_p7 = pneg %p1062_p2 }
 0x3f7   : > { %p1069_p9 = por %p1068_p6, %p1067_p4 }
 0x3f9   : > { %p1070_p12 = pnand %p1069_p9, %p1063_p7 }
 0x3fb   : > { %1073 = shalt.err (!%p1070_p12)
}
 0x3fc   : > { %923 = dma.vmem_to_hbm [thread:$0]  (%p1261_p8), %s1397_s21, 256, %s1395_s9, %s790_s28  }
 0x3fd PF: > { %s816_s22 = sand.u32 1, %s1104_s24   ;;  %p1465_p13 = scmp.ne.s32.totalorder %s1451_s8, 0 }
 0x3fe   : > { %p1466_p0 = scmp.ge.s32.totalorder %s1116_s27, 2  ;;  %s817_s30 = scalar_lea.sflag [#allocation4], %s816_s22 }
 0x400   : > { %p934_p5 = pnand %p1466_p0, %p1465_p13 }
 0x402   : > { %1099 = dma.done.wait (!%p934_p5), %s817_s30, 256  }
 0x403   : > { %1101 = vsyncadd (!%p934_p5), %s817_s30, 4294967040  ;;  %p21_p10 = scmp.ge.s32.totalorder %s1217_s12, 4   ;;  %s1467_s24 = smov %s1108_s25 }
 0x404   : > { %s1468_s25 = smov %s1112_s26  ;;  %s1469_s26 = smov %s1253_s17 }
 0x405   : > { %s1470_s27 = smov %s1217_s12  ;;  %23 = sbr.rel (!%p21_p10) target bundleno = 6 (0x6), region = 100 }
 0x40c   :  { %822 = vsyncpa [#allocation3], 1 }
 0x40d   :  { %824 = vsyncpa [#allocation3 + $0x1], 1 }
 0x40e   :  { %825 = vsyncpa [#allocation6], 1 }
 0x40f   :  { %826 = vsyncpa [#allocation4], 1 }
 0x410   :  { %828 = vsyncpa [#allocation4 + $0x1], 1 }

</bundles_post_ra>
